<compile_context>
chip_gen: v7x
topology: tpu7x:2x2x1
jax: 0.10.0
libtpu: 0.0.40
codegen_flags: <defaults>
</compile_context>

<pallas_src>
import jax
import jax.numpy as jnp
from jax import lax
from jax.experimental import pallas as pl
from jax.experimental.pallas import tpu as pltpu


def _round_up(a: int, b: int) -> int:
    return ((a + b - 1) // b) * b


def _largest_div128(hp: int, upper: int) -> int:
    """Largest multiple of 128 that divides hp and is <= upper (hp % 128 == 0)."""
    upper = max(128, (upper // 128) * 128)
    best, t = 128, 128
    while t <= upper:
        if hp % t == 0:
            best = t
        t += 128
    return best


def _gated_attention_kernel(x_ref, w_ref, b_ref, out_ref, gate_ref):
    # x_ref:    [TM, Hp]   input rows (full hidden axis, needed for the contraction)
    # w_ref:    [TN, Hp]   nn.Linear-layout weight slice ([out, in]) in the matmul dtype
    # b_ref:    [1,  TN]   bias slice
    # out_ref:  [TM, TN]   gated output tile
    # gate_ref: [TM, TN]   sigmoid gate ("self.weights" in the torch module)
    j = pl.program_id(0)          # output-column (weight) tile index -- OUTERMOST grid axis
    tile_n = out_ref.shape[1]

    x = x_ref[...]
    # Linear layer: x @ W^T via dot_general contracting both "in" axes.  The MXU handles
    # the rhs-transposed contraction natively; accumulate in f32.  Operands are cast to
    # the weight dtype (bf16 for f32 inputs -> bf16-native MXU throughput).
    z = lax.dot_general(
        x.astype(w_ref.dtype),
        w_ref[...],
        dimension_numbers=(((1,), (1,)), ((), ())),
        preferred_element_type=jnp.float32,
    )
    z = z + b_ref[...].astype(jnp.float32)
    gate = jax.nn.sigmoid(z)      # f32, EUP

    if tile_n == x_ref.shape[1]:
        x_cols = x                # full-hidden output tile: gate the whole row block
    else:
        col0 = pl.multiple_of(j * tile_n, tile_n)      # lane-aligned column window
        x_cols = x_ref[:, pl.ds(col0, tile_n)]

    gate_ref[...] = gate.astype(gate_ref.dtype)
    # Multiply in f32, single cast at the store.
    out_ref[...] = (gate * x_cols.astype(jnp.float32)).astype(out_ref.dtype)


def gated_attention(x, w, b, *, tile_m=None, tile_n=None, gate_dtype=None,
                    matmul_dtype=None):
    """GatedAttention forward.

    x: [..., H];  w: [H, H] PyTorch nn.Linear weight ([out, in]);  b: [H].
    Returns (out, gate), both shaped like x.
    """
    orig_shape = x.shape
    H = orig_shape[-1]
    assert w.shape == (H, H) and b.shape == (H,)

    x2 = x.reshape(-1, H)
    M = x2.shape[0]

    out_dtype = x2.dtype
    gate_dtype = x2.dtype if gate_dtype is None else jnp.dtype(gate_dtype)
    if matmul_dtype is None:
        # bf16 MXU operands for f32 inputs (f32 accumulation is kept in-kernel).
        matmul_dtype = jnp.bfloat16 if x2.dtype == jnp.dtype(jnp.float32) else x2.dtype
    matmul_dtype = jnp.dtype(matmul_dtype)

    # ---- Lane-dense padding of the hidden axis (multiple of 128). Zero padding keeps the
    # matmul exact for valid columns; padded gate columns are sliced off below. -----------
    Hp = _round_up(H, 128)
    if Hp != H:
        x2 = jnp.pad(x2, ((0, 0), (0, Hp - H)))
        w = jnp.pad(w, ((0, Hp - H), (0, Hp - H)))
        b = jnp.pad(b, (0, Hp - H))
    w_mm = w.astype(matmul_dtype)       # cast once in HBM (halves W DMA for f32 inputs)
    b2 = b.reshape(1, Hp)

    # ---- Per-generation VMEM budget. ------------------------------------------------------
    try:
        vmem_cap = int(pltpu.get_tpu_info().vmem_capacity_bytes)
    except Exception:
        vmem_cap = 64 << 20             # conservative: v7x per-TensorCore VMEM
    vmem_budget = int(vmem_cap * 0.80)

    x_sz = jnp.dtype(x2.dtype).itemsize
    w_sz = matmul_dtype.itemsize
    o_sz = jnp.dtype(out_dtype).itemsize
    g_sz = jnp.dtype(gate_dtype).itemsize

    def vmem_needed(tm, tn):
        return (2 * tm * Hp * x_sz          # x row tiles (double-buffered)
                + 2 * tn * Hp * w_sz        # weight slice (double-buffered)
                + 2 * 8 * tn * 4            # bias slice (8-sublane padded)
                + 2 * tm * tn * o_sz        # out tiles
                + 2 * tm * tn * g_sz        # gate tiles
                + tm * Hp * w_sz            # in-kernel cast of x for the MXU
                + 3 * tm * tn * 4)          # z / gate / gated-product f32 intermediates

    # ---- Output-column tile: full hidden by default -> W resident, DMA'd exactly once. ----
    if tile_n is None:
        tile_n = Hp
    else:
        tile_n = _largest_div128(Hp, max(128, _round_up(int(tile_n), 128)))

    # ---- Row tile: ~8 row blocks, clamped to [128, 4096] and to the row count. ------------
    if tile_m is None:
        tile_m = _round_up(max(1, -(-M // 8)), 8)
        tile_m = min(max(tile_m, 128), 4096)
    tile_m = max(8, _round_up(int(tile_m), 8))
    tile_m = min(tile_m, _round_up(M, 8))

    # ---- Shrink until the double-buffered footprint fits: tile_n first, then tile_m. ------
    while vmem_needed(tile_m, tile_n) > vmem_budget:
        if tile_n > 128:
            tile_n = _largest_div128(Hp, max(128, tile_n // 2))
        elif tile_m > 8:
            tile_m = max(8, _round_up(tile_m // 2, 8))
        else:
            break

    num_n = Hp // tile_n
    num_m = pl.cdiv(M, tile_m)          # last row block may be partial (masked stores)

    vmem_limit = int(min(max(vmem_needed(tile_m, tile_n) + (8 << 20), 32 << 20),
                         int(vmem_cap * 0.90)))

    out, gate = pl.pallas_call(
        _gated_attention_kernel,
        out_shape=(
            jax.ShapeDtypeStruct((M, Hp), out_dtype),
            jax.ShapeDtypeStruct((M, Hp), gate_dtype),
        ),
        grid_spec=pltpu.PrefetchScalarGridSpec(
            num_scalar_prefetch=0,
            # Weight axis OUTERMOST: each W slice's block index is constant over the inner
            # row loop, so it is DMA'd once (exactly once in total when num_n == 1).
            grid=(num_n, num_m),
            in_specs=[
                pl.BlockSpec((tile_m, Hp), lambda j, i: (i, 0)),    # x rows (full hidden)
                pl.BlockSpec((tile_n, Hp), lambda j, i: (j, 0)),    # W slice [out, in]
                pl.BlockSpec((1, tile_n), lambda j, i: (0, j)),     # bias slice
            ],
            out_specs=[
                pl.BlockSpec((tile_m, tile_n), lambda j, i: (i, j)),  # gated output
                pl.BlockSpec((tile_m, tile_n), lambda j, i: (i, j)),  # sigmoid gate
            ],
        ),
        compiler_params=pltpu.CompilerParams(
            dimension_semantics=("parallel", "parallel"),
            vmem_limit_bytes=vmem_limit,
        ),
    )(x2, w_mm, b2)

    if Hp != H:
        out = out[:, :H]
        gate = gate[:, :H]
    return out.reshape(orig_shape), gate.reshape(orig_shape)


def gated_attention_ref(x, w, b):
    gate = jax.nn.sigmoid(jnp.einsum("...i,oi->...o", x, w) + b)
    return gate * x, gate


if __name__ == "__main__":
    key = jax.random.PRNGKey(0)
    B, S, H = 2, 8, 32
    kx, kw, kb = jax.random.split(key, 3)

    x = jax.random.normal(kx, (B, S, H), dtype=jnp.float32)
    # nn.Linear-shaped parameters: W [H, H] = [out, in], b [H].
    limit = 1.0 / (H ** 0.5)
    w = jax.random.uniform(kw, (H, H), minval=-limit, maxval=limit, dtype=jnp.float32)
    b = jax.random.uniform(kb, (H,), minval=-limit, maxval=limit, dtype=jnp.float32)

    out_ref, gate_ref = gated_attention_ref(x, w, b)

    # Exact-precision path (f32 MXU operands): tight tolerance.
    out, gate = gated_attention(x, w, b, matmul_dtype=jnp.float32)
    jax.block_until_ready((out, gate))
    assert jnp.allclose(out, out_ref, atol=1e-5, rtol=1e-5)
    assert jnp.allclose(gate, gate_ref, atol=1e-5, rtol=1e-5)

    # Default fast path (bf16 MXU operands, f32 accumulation): looser tolerance.
    out_fast, gate_fast = gated_attention(x, w, b)
    jax.block_until_ready((out_fast, gate_fast))
    assert jnp.allclose(out_fast, out_ref, atol=2e-2, rtol=2e-2)
    assert jnp.allclose(gate_fast, gate_ref, atol=2e-2, rtol=2e-2)

    # Ragged shape: H not a multiple of 128 and M not a multiple of the row tile
    # (exercises hidden-axis padding and the partial last row block).
    B2, S2, H2 = 3, 7, 48
    x3 = jax.random.normal(kx, (B2, S2, H2), dtype=jnp.float32)
    lim2 = 1.0 / (H2 ** 0.5)
    w3 = jax.random.uniform(kw, (H2, H2), minval=-lim2, maxval=lim2, dtype=jnp.float32)
    b3 = jax.random.uniform(kb, (H2,), minval=-lim2, maxval=lim2, dtype=jnp.float32)
    out3, gate3 = gated_attention(x3, w3, b3, matmul_dtype=jnp.float32)
    jax.block_until_ready((out3, gate3))
    out3_ref, gate3_ref = gated_attention_ref(x3, w3, b3)
    assert jnp.allclose(out3, out3_ref, atol=1e-5, rtol=1e-5)
    assert jnp.allclose(gate3, gate3_ref, atol=1e-5, rtol=1e-5)

    print("KERNEL_OK")
</pallas_src>

<mosaic_0001>
module attributes {stable_mosaic.version = 11 : i64} {
  func.func @_gated_attention_kernel(%arg0: i32, %arg1: i32, %arg2: memref<16x128xf32, #tpu.memory_space<vmem>>, %arg3: memref<128x128xf32, #tpu.memory_space<vmem>>, %arg4: memref<1x128xf32, #tpu.memory_space<vmem>>, %arg5: memref<16x128xf32, #tpu.memory_space<vmem>>, %arg6: memref<16x128xf32, #tpu.memory_space<vmem>>) attributes {dimension_semantics = [#tpu.dimension_semantics<parallel>, #tpu.dimension_semantics<parallel>], iteration_bounds = array<i64: 1, 1>, scalar_prefetch = 0 : i64, scratch_operands = 0 : i64, tpu.core_type = #tpu.core_type<tc>, window_params = [{transform_indices = @transform_0, window_bounds = array<i64: 16, 128>}, {transform_indices = @transform_1, window_bounds = array<i64: 128, 128>}, {transform_indices = @transform_2, window_bounds = array<i64: 1, 128>}, {transform_indices = @transform_3, window_bounds = array<i64: 16, 128>}, {transform_indices = @transform_4, window_bounds = array<i64: 16, 128>}]} {
    %c0 = arith.constant 0 : index
    %c0_0 = arith.constant 0 : index
    %0 = vector.load %arg2[%c0, %c0_0] : memref<16x128xf32, #tpu.memory_space<vmem>>, vector<16x128xf32>
    %c0_1 = arith.constant 0 : index
    %c0_2 = arith.constant 0 : index
    %1 = vector.load %arg3[%c0_1, %c0_2] : memref<128x128xf32, #tpu.memory_space<vmem>>, vector<128x128xf32>
    %cst = arith.constant dense<0.000000e+00> : vector<16x128xf32>
    %2 = tpu.matmul %0, %1, %cst {dimension_numbers = #tpu.dot_dimension_numbers<[1], [1], [0], [0], [0, 0, 1, 0], [], []>} : vector<16x128xf32>, vector<128x128xf32>, vector<16x128xf32> -> vector<16x128xf32>
    %c0_3 = arith.constant 0 : index
    %c0_4 = arith.constant 0 : index
    %3 = vector.load %arg4[%c0_3, %c0_4] : memref<1x128xf32, #tpu.memory_space<vmem>>, vector<1x128xf32>
    %4 = vector.broadcast %3 : vector<1x128xf32> to vector<16x128xf32>
    %5 = arith.addf %2, %4 : vector<16x128xf32>
    %6 = arith.negf %5 : vector<16x128xf32>
    %7 = math.exp %6 : vector<16x128xf32>
    %cst_5 = arith.constant 1.000000e+00 : f32
    %8 = vector.broadcast %cst_5 : f32 to vector<16x128xf32>
    %9 = arith.addf %8, %7 : vector<16x128xf32>
    %10 = arith.divf %8, %9 : vector<16x128xf32>
    %c0_6 = arith.constant 0 : index
    %c0_7 = arith.constant 0 : index
    %11 = vector.load %arg6[%c0_6, %c0_7] : memref<16x128xf32, #tpu.memory_space<vmem>>, vector<16x128xf32>
    tpu.vector_store %arg6[%c0_6, %c0_7], %10 {strides = array<i32>} : memref<16x128xf32, #tpu.memory_space<vmem>>, vector<16x128xf32>,
    %12 = arith.mulf %10, %0 : vector<16x128xf32>
    %c0_8 = arith.constant 0 : index
    %c0_9 = arith.constant 0 : index
    %13 = vector.load %arg5[%c0_8, %c0_9] : memref<16x128xf32, #tpu.memory_space<vmem>>, vector<16x128xf32>
    tpu.vector_store %arg5[%c0_8, %c0_9], %12 {strides = array<i32>} : memref<16x128xf32, #tpu.memory_space<vmem>>, vector<16x128xf32>,
    return
  }
  func.func @transform_0(%arg0: i32, %arg1: i32) -> (i32, i32) {
    %c0_i32 = arith.constant 0 : i32
    %c0_i32_0 = arith.constant 0 : i32
    return %arg1, %c0_i32 : i32, i32
  }
  func.func @transform_1(%arg0: i32, %arg1: i32) -> (i32, i32) {
    %c0_i32 = arith.constant 0 : i32
    %c0_i32_0 = arith.constant 0 : i32
    return %arg0, %c0_i32 : i32, i32
  }
  func.func @transform_2(%arg0: i32, %arg1: i32) -> (i32, i32) {
    %c0_i32 = arith.constant 0 : i32
    %c0_i32_0 = arith.constant 0 : i32
    return %c0_i32, %arg0 : i32, i32
  }
  func.func @transform_3(%arg0: i32, %arg1: i32) -> (i32, i32) {
    %c0_i32 = arith.constant 0 : i32
    return %arg1, %arg0 : i32, i32
  }
  func.func @transform_4(%arg0: i32, %arg1: i32) -> (i32, i32) {
    %c0_i32 = arith.constant 0 : i32
    return %arg1, %arg0 : i32, i32
  }
}

</mosaic_0001>

<bundles_post_ra>
// kernel: tpu_custom_call.1
= control target key start
LH: loop header
LB: loop body
LE: loop exit
PB: predicated region body
PF: predicated region fallthrough
CT: control target
= control target key end

     0   :  { %10 = vsyncpa [#allocation3], 0  ;;  %s497_s0 = inlined_call_operand.hbm [shape: f32[16,128], index: 0, kind: input, shape index: {}]   ;;  %s498_s1 = inlined_call_operand.hbm [shape: f32[128,128], index: 1, kind: input, shape index: {}]   ;;  %s499_s2 = inlined_call_operand.vmem [shape: f32[1,128], index: 2, kind: input, shape index: {}]   ;;  %s500_s3 = inlined_call_operand.hbm [shape: f32[16,128], index: 3, kind: output, shape index: {0}]   ;;  %s501_s4 = inlined_call_operand.hbm [shape: f32[16,128], index: 4, kind: output, shape index: {1}]  }
   0x1   :  { %11 = vsyncpa [#allocation6], 0 }
   0x2   :  { %12 = vsyncpa [#allocation4], 0 }
   0x3   :  { %13 = vsyncpa [#allocation9], 0  ;;  %s396_s15 = smov [#allocation2]   ;;  %s300_s19 = scalar_lea.hbm %s497_s0, 256 }
   0x4   :  { %s19_s16 = sshll.u32 %s396_s15, 4  ;;  %p301_p0 = scmp.ne.s32.totalorder %s497_s0, %s300_s19  ;;  %s20_s16 = int_to_ptr.vmem [resolvable:$true] %s19_s16 }
   0x5   :  { %p304_p1 = scmp.lt.u32.totalorder %s300_s19, %s497_s0 }
   0x7   :  { %p306_p2 = pnand %p304_p1, %p301_p0 }
   0x9   :  { %309 = shalt.err (!%p306_p2)
}
   0xa   :  { %s310_s24 = scalar_lea.vmem %s20_s16, 256  ;;  %p315_p4 = scmp.lt.s32.totalorder %s20_s16, %s20_s16 }
   0xb   :  { %p311_p3 = scmp.ne.s32.totalorder %s20_s16, %s310_s24  ;;  %p316_p5 = scmp.lt.s32.totalorder %s310_s24, %s310_s24 }
   0xd   :  { %p317_p6 = por %p316_p5, %p315_p4 }
   0xf   :  { %p318_p7 = pnand %p317_p6, %p311_p3 }
  0x11   :  { %321 = shalt.err (!%p318_p7)
}
  0x12   :  { %s397_s25 = smov 128   ;;  %s398_s26 = smov 8  }
  0x13   :  { %25 = dma.hbm_to_vmem [thread:$0]  %s497_s0, 256, %s20_s16, [#allocation3], %s397_s25, %s397_s25, %s398_s26  }
  0x14   :  { %s399_s29 = smov [#allocation5]   ;;  %s322_s7 = scalar_lea.hbm %s498_s1, 2048 }
  0x15   :  { %s31_s30 = sshll.u32 %s399_s29, 4  ;;  %p323_p8 = scmp.ne.s32.totalorder %s498_s1, %s322_s7  ;;  %s32_s30 = int_to_ptr.vmem [resolvable:$true] %s31_s30 }
  0x16   :  { %p326_p9 = scmp.lt.u32.totalorder %s322_s7, %s498_s1 }
  0x18   :  { %p328_p10 = pnand %p326_p9, %p323_p8 }
  0x1a   :  { %331 = shalt.err (!%p328_p10)
}
  0x1b   :  { %s332_s12 = scalar_lea.vmem %s32_s30, 2048  ;;  %p337_p12 = scmp.lt.s32.totalorder %s32_s30, %s32_s30 }
  0x1c   :  { %p333_p11 = scmp.ne.s32.totalorder %s32_s30, %s332_s12  ;;  %p338_p13 = scmp.lt.s32.totalorder %s332_s12, %s332_s12 }
  0x1e   :  { %p339_p0 = por %p338_p13, %p337_p12 }
  0x20   :  { %p340_p1 = pnand %p339_p0, %p333_p11 }
  0x22   :  { %343 = shalt.err (!%p340_p1)
}
  0x23   :  { %37 = dma.hbm_to_vmem [thread:$0]  %s498_s1, 2048, %s32_s30, [#allocation6], %s397_s25, %s397_s25, %s398_s26  }
  0x24   :  { %388 = dma.done.wait [#allocation3], 256  }
  0x25   :  { %389 = vsyncadd [#allocation3], 4294967040 }
  0x26   :  { %390 = dma.done.wait [#allocation6], 2048  }
  0x27   :  { %391 = vsyncadd [#allocation6], 4294965248  ;;  %v48_v0 = vld [vmem:[#allocation5] sm:$0xff]  ;;  %v49_v1 = vld [vmem:[#allocation5 + $0x8] sm:$0xff]  ;;  %s400_s15 = smov [#allocation8]   ;;  %s401_s17 = smov [#allocation7]  }
  0x28   :  { %v50_v2 = vld [vmem:[#allocation5 + $0x10] sm:$0xff]  ;;  %v254_v3 = vpack.c.bf16 %v49_v1, %v48_v0  ;;  %v51_v4 = vld [vmem:[#allocation5 + $0x18] sm:$0xff]  ;;  %v52_v7 = vld [vmem:[#allocation5 + $0x20] sm:$0xff]  ;;  %s181_s16 = sshll.u32 %s400_s15, 4  ;;  %s169_s18 = sshll.u32 %s401_s17, 4  ;;  %s182_s16 = int_to_ptr.vmem [resolvable:$true] %s181_s16  ;;  %s460_s18 = int_to_ptr.vmem [resolvable:$true] %s169_s18 }
  0x29   :  { %v258_v5 = vpack.c.bf16 %v51_v4, %v50_v2  ;;  %v46_v6 = vld [vmem:[#allocation2] sm:$0xff]  ;;  %v53_v8 = vld [vmem:[#allocation5 + $0x28] sm:$0xff]  ;;  %v55_v11 = vld [vmem:[#allocation5 + $0x38] sm:$0xff]  ;;  %p349_p3 = scmp.lt.s32.totalorder %s182_s16, %s182_s16 }
  0x2a   :  { %255 = vmatprep.subr.bf16.mxu0 %v254_v3  ;;  %251 = vmatprep.mubr.f32.mxu0 %v46_v6  ;;  %v262_v9 = vpack.c.bf16 %v53_v8, %v52_v7  ;;  %v54_v10 = vld [vmem:[#allocation5 + $0x30] sm:$0xff]  ;;  %v56_v13 = vld [vmem:[#allocation5 + $0x40] sm:$0xff]  ;;  %v57_v14 = vld [vmem:[#allocation5 + $0x48] sm:$0xff] }
  0x2b   :  { %257 = vmatpush3.bf16.xpose.msra.mxu0 %v254_v3  ;;  %v266_v12 = vpack.c.bf16 %v55_v11, %v54_v10  ;;  %v270_v15 = vpack.c.bf16 %v57_v14, %v56_v13  ;;  %v58_v16 = vld [vmem:[#allocation5 + $0x50] sm:$0xff]  ;;  %v59_v17 = vld [vmem:[#allocation5 + $0x58] sm:$0xff]  ;;  %v60_v19 = vld [vmem:[#allocation5 + $0x60] sm:$0xff] }
  0x2c   :  { %259 = vmatprep.subr.bf16.mxu0 %v258_v5  ;;  %v274_v18 = vpack.c.bf16 %v59_v17, %v58_v16  ;;  %v61_v20 = vld [vmem:[#allocation5 + $0x68] sm:$0xff]  ;;  %v62_v22 = vld [vmem:[#allocation5 + $0x70] sm:$0xff]  ;;  %v63_v23 = vld [vmem:[#allocation5 + $0x78] sm:$0xff] }
  0x2d   :  { %v278_v21 = vpack.c.bf16 %v61_v20, %v60_v19  ;;  %v282_v24 = vpack.c.bf16 %v63_v23, %v62_v22  ;;  %v47_v25 = vld [vmem:[#allocation2 + $0x8] sm:$0xff]  ;;  %v198_v26 = vld [vmem:[%s499_s2] ss:$0 sm:$0xff]  ;;  %s344_s2 = scalar_lea.vmem %s182_s16, 256 }
  0x2e   :  { %p345_p2 = scmp.ne.s32.totalorder %s182_s16, %s344_s2  ;;  %p350_p4 = scmp.lt.s32.totalorder %s344_s2, %s344_s2 }
  0x30   :  { %p351_p5 = por %p350_p4, %p349_p3 }
  0x32   :  { %p352_p6 = pnand %p351_p5, %p345_p2 }
  0x33   :  { %261 = vmatpush3.bf16.xpose.msra.mxu0 %v258_v5 }
  0x34   :  { %263 = vmatprep.subr.bf16.mxu0 %v262_v9 }
  0x3b   :  { %265 = vmatpush3.bf16.xpose.msra.mxu0 %v262_v9 }
  0x3c   :  { %267 = vmatprep.subr.bf16.mxu0 %v266_v12 }
  0x43   :  { %269 = vmatpush3.bf16.xpose.msra.mxu0 %v266_v12 }
  0x44   :  { %271 = vmatprep.subr.bf16.mxu0 %v270_v15 }
  0x4b   :  { %273 = vmatpush3.bf16.xpose.msra.mxu0 %v270_v15 }
  0x4c   :  { %275 = vmatprep.subr.bf16.mxu0 %v274_v18 }
  0x53   :  { %277 = vmatpush3.bf16.xpose.msra.mxu0 %v274_v18 }
  0x54   :  { %279 = vmatprep.subr.bf16.mxu0 %v278_v21 }
  0x5b   :  { %281 = vmatpush3.bf16.xpose.msra.mxu0 %v278_v21 }
  0x5c   :  { %283 = vmatprep.subr.bf16.mxu0 %v282_v24 }
  0x63   :  { %285 = vmatpush3.bf16.xpose.msra.mxu0 %v282_v24 }
  0x6a   :  { %252 = vmatmul.mubr.f32.vlgmr.msra.gmra.mrb[0].mxu0 %v47_v25 }
 0x13d   :  { %v253_v27 = vpop.f32.mrb[0].mxu0 }
 0x13e   :  { %v143_v28 = vadd.f32 %v253_v27, %v198_v26  ;;  %v137_v29 = vpop.f32.mrb[1].mxu0 }
 0x13f   :  { %v138_v30 = vadd.f32 %v198_v26, %v137_v29 }
 0x140   :  { %v200_v31 = vmul.f32 -1.442695, %v143_v28 }
 0x141   :  { %v199_v32 = vmul.f32 -1.442695, %v138_v30 }
 0x142   :  { %292 = vpow2.f32 %v200_v31 }
 0x143   :  { %294 = vpow2.f32 %v199_v32 }
 0x14c   :  { %v293_v33 = vpop.eup %292 }
 0x14d   :  { %v295_v34 = vpop.eup %294  ;;  %v153_v35 = vadd.f32 1.0, %v293_v33 }
 0x14e   :  { %v152_v36 = vadd.f32 1.0, %v295_v34 }
 0x14f   :  { %296 = vrcp.f32 %v153_v35 }
 0x150   :  { %298 = vrcp.f32 %v152_v36 }
 0x159   :  { %v297_v37 = vpop.eup %296 }
 0x15a   :  { %v299_v38 = vpop.eup %298  ;;  %159 = vst [vmem:[#allocation8 + $0x8] sm:$0xff] %v297_v37  ;;  %v161_v39 = vmul.f32 %v297_v37, %v47_v25 }
 0x15b   :  { %158 = vst [vmem:[#allocation8] sm:$0xff] %v299_v38  ;;  %v160_v40 = vmul.f32 %v299_v38, %v46_v6 }
 0x15c   :  { %163 = vst [vmem:[#allocation7 + $0x8] sm:$0xff] %v161_v39 }
 0x15d   :  { %355 = shalt.err (!%p352_p6)
}
 0x15e   :  { %s356_s21 = scalar_lea.hbm %s501_s4, 256 }
 0x15f   :  { %p357_p7 = scmp.ne.s32.totalorder %s501_s4, %s356_s21  ;;  %p360_p8 = scmp.lt.u32.totalorder %s356_s21, %s501_s4 }
 0x161   :  { %p362_p9 = pnand %p360_p8, %p357_p7 }
 0x163   :  { %365 = shalt.err (!%p362_p9)
}
 0x164   :  { %187 = dma.vmem_to_hbm [thread:$0]  %s182_s16, 256, %s501_s4, [#allocation9], %s397_s25, %s397_s25, %s398_s26   ;;  %162 = vst [vmem:[#allocation7] sm:$0xff] %v160_v40 }
 0x165   :  { %s366_s30 = scalar_lea.vmem %s460_s18, 256  ;;  %p371_p11 = scmp.lt.s32.totalorder %s460_s18, %s460_s18 }
 0x166   :  { %p367_p10 = scmp.ne.s32.totalorder %s460_s18, %s366_s30  ;;  %p372_p12 = scmp.lt.s32.totalorder %s366_s30, %s366_s30 }
 0x168   :  { %p373_p13 = por %p372_p12, %p371_p11 }
 0x16a   :  { %p374_p0 = pnand %p373_p13, %p367_p10 }
 0x16c   :  { %377 = shalt.err (!%p374_p0)
}
 0x16d   :  { %s378_s7 = scalar_lea.hbm %s500_s3, 256 }
 0x16e   :  { %p379_p1 = scmp.ne.s32.totalorder %s500_s3, %s378_s7  ;;  %p382_p2 = scmp.lt.u32.totalorder %s378_s7, %s500_s3 }
 0x170   :  { %p384_p3 = pnand %p382_p2, %p379_p1 }
 0x172   :  { %387 = shalt.err (!%p384_p3)
}
 0x173   :  { %175 = dma.vmem_to_hbm [thread:$0]  %s460_s18, 256, %s500_s3, [#allocation4], %s397_s25, %s397_s25, %s398_s26  }
 0x174   :  { %392 = dma.done.wait [#allocation4], 256  }
 0x175   :  { %393 = vsyncadd [#allocation4], 4294967040 }
 0x176   :  { %394 = dma.done.wait [#allocation9], 256  }
 0x177   :  { %395 = vsyncadd [#allocation9], 4294967040 }
 0x178   :  { %194 = vsyncpa [#allocation3], 1 }
 0x179   :  { %195 = vsyncpa [#allocation6], 1 }
 0x17a   :  { %196 = vsyncpa [#allocation4], 1 }
 0x17b   :  { %197 = vsyncpa [#allocation9], 1 }

</bundles_post_ra>
